<compile_context>
chip_gen: v5e
topology: v5e:2x2
jax: 0.10.0
libtpu: 0.0.40
codegen_flags: <defaults>
</compile_context>

<pallas_src>
import functools
import math

import jax
import jax.numpy as jnp
from jax.experimental import pallas as pl
from jax.experimental.pallas import tpu as pltpu

LANE = 128
SUBLANE = 8


# ------------------------------ helpers -------------------------------------


def _round_up(x, m):
    return (x + m - 1) // m * m


def _pad2d(a, rows, cols):
    r, c = a.shape
    if r == rows and c == cols:
        return a
    return jnp.pad(a, ((0, rows - r), (0, cols - c)))


def _vmem_capacity_bytes():
    """Generation-aware VMEM capacity (v5e/v6e: 128 MiB, v7x: 64 MiB)."""
    try:
        cap = getattr(pltpu.get_tpu_info(), "vmem_capacity_bytes", None)
        if cap:
            return int(cap)
    except Exception:
        pass
    return 64 * 1024 * 1024  # conservative fallback valid on every generation


def _masked_log_softmax(h, n_valid):
    """log_softmax along the lane (class) axis restricted to the first n_valid lanes."""
    cols = jax.lax.broadcasted_iota(jnp.int32, h.shape, dimension=1)
    valid = cols < n_valid
    logits = jnp.where(valid, h, jnp.float32(-1e30))
    m = jnp.max(logits, axis=1, keepdims=True)
    shifted = logits - m
    lse = jnp.log(jnp.sum(jnp.exp(shifted), axis=1, keepdims=True))
    return jnp.where(valid, shifted - lse, 0.0)


def _finalize(agg_f32, b_f32, n_class, final_layer):
    """bias + ReLU (+ masked log_softmax on the final layer) in f32 on the VPU."""
    h = jnp.maximum(agg_f32 + b_f32, 0.0)
    if final_layer:
        h = _masked_log_softmax(h, n_class)
    return h


# ----------------------------- Pallas kernels --------------------------------


def _gcn_fused_kernel(*refs, num_layers, n_class, mxu_dtype):
    """Entire GCN forward in one kernel (small graphs, everything VMEM-resident)."""
    x_ref, adj_ref = refs[0], refs[1]
    out_ref = refs[2 + 2 * num_layers]

    adj = adj_ref[...]                               # already mxu dtype
    h = jnp.maximum(x_ref[...], 0.0)                 # F.relu(input)

    for i in range(num_layers):
        w = refs[2 + 2 * i][...]                     # (f_in_p, f_out_p) mxu dtype
        b = refs[3 + 2 * i][...]                     # (1, f_out_p) f32
        support = jnp.dot(h.astype(mxu_dtype), w, preferred_element_type=jnp.float32)
        agg = jnp.dot(adj, support.astype(mxu_dtype), preferred_element_type=jnp.float32)
        h = _finalize(agg, b, n_class, final_layer=(i == num_layers - 1))
        # TODO(synk): dropout(training=True) not implemented (eval-mode identity).

    out_ref[...] = h.astype(out_ref.dtype)


def _support_kernel(h_ref, w_ref, out_ref, *, input_relu, mxu_dtype):
    """support = relu?(h_tile) @ W   (node-tiled, W whole-resident)."""
    h = h_ref[...]
    if input_relu:
        h = jnp.maximum(h, 0.0)                      # folds F.relu(input) into layer 0
    out_ref[...] = jnp.dot(h.astype(mxu_dtype), w_ref[...],
                           preferred_element_type=jnp.float32).astype(out_ref.dtype)


def _aggregate_kernel(adj_ref, sup_ref, b_ref, out_ref, *scratch,
                      n_class, final_layer, sup_resident, acc_into_out):
    """out[m] = relu(sum_k adj[m,k] @ support[k] + b)  (+ log_softmax on last layer).

    support is whole-array VMEM-resident (sliced with pl.ds) when it fits;
    the reduction accumulates directly into out_ref when its dtype allows."""
    k = pl.program_id(1)

    if sup_resident:
        blk_k = adj_ref.shape[1]
        start = pl.multiple_of(k * blk_k, blk_k)
        sup = sup_ref[pl.ds(start, blk_k), :]
    else:
        sup = sup_ref[...]

    part = jnp.dot(adj_ref[...], sup, preferred_element_type=jnp.float32)

    acc_ref = out_ref if acc_into_out else scratch[0]

    @pl.when(k == 0)
    def _():
        acc_ref[...] = part.astype(acc_ref.dtype)

    @pl.when(k > 0)
    def _():
        acc_ref[...] = (acc_ref[...].astype(jnp.float32) + part).astype(acc_ref.dtype)

    @pl.when(k == pl.num_programs(1) - 1)
    def _():
        out_ref[...] = _finalize(acc_ref[...].astype(jnp.float32), b_ref[...],
                                 n_class, final_layer).astype(out_ref.dtype)


# ------------------------------ wrappers --------------------------------------


def _gcn_fused(x_pad, adj_pad, params_pad, *, n_class, mxu_dtype, vmem_limit):
    num_layers = len(params_pad)
    n_pad = x_pad.shape[0]
    c_pad = params_pad[-1][0].shape[1]
    flat = []
    for (w, b) in params_pad:
        flat += [w, b]
    kernel = functools.partial(_gcn_fused_kernel, num_layers=num_layers,
                               n_class=n_class, mxu_dtype=mxu_dtype)
    vmem_spec = pl.BlockSpec(memory_space=pltpu.MemorySpace.VMEM)
    # NOTE: gridless (single TensorCore). Layer fusion needs the FULL previous
    # activation for every output row, so a megacore-"parallel" node axis can't
    # be used here without redundant per-row-tile recomputation of all hidden
    # layers; larger graphs take the per-layer tiled path (node axis "parallel").
    return pl.pallas_call(
        kernel,
        out_shape=jax.ShapeDtypeStruct((n_pad, c_pad), jnp.float32),
        in_specs=[vmem_spec] * (2 + len(flat)),
        out_specs=vmem_spec,
        compiler_params=pltpu.CompilerParams(vmem_limit_bytes=vmem_limit),
    )(x_pad, adj_pad, *flat)


def _gcn_tiled(x_pad, adj_pad, params_pad, *, n_class, mxu_dtype,
               blk_m, blk_k, vmem_limit, vmem_cap):
    """Per-layer grid/BlockSpec path for graphs that do not fit whole in VMEM."""
    n_pad = x_pad.shape[0]
    n_m = n_pad // blk_m
    n_k = n_pad // blk_k
    num_layers = len(params_pad)
    itm = jnp.dtype(mxu_dtype).itemsize

    h = x_pad                                        # already mxu dtype
    for i, (w, b) in enumerate(params_pad):
        f_in, f_out = w.shape

        # ---- support = relu?(h) @ W  -----------------------------------------
        # node-tiled ("parallel" -> both TCs on v7x), W whole-resident, bf16 output
        # (halves the writeback and the aggregate step's read).
        support = pl.pallas_call(
            functools.partial(_support_kernel, input_relu=(i == 0), mxu_dtype=mxu_dtype),
            out_shape=jax.ShapeDtypeStruct((n_pad, f_out), mxu_dtype),
            grid=(n_m,),
            in_specs=[pl.BlockSpec((blk_m, f_in), lambda m: (m, 0)),
                      pl.BlockSpec((f_in, f_out), lambda m: (0, 0))],
            out_specs=pl.BlockSpec((blk_m, f_out), lambda m: (m, 0)),
            compiler_params=pltpu.CompilerParams(
                dimension_semantics=("parallel",),
                vmem_limit_bytes=vmem_limit),
        )(h, w)

        # ---- h = relu(adj @ support + b)  (+ log_softmax on the final layer) --
        final_layer = (i == num_layers - 1)
        out_dtype = jnp.float32 if final_layer else mxu_dtype
        # Keep support whole-resident in VMEM (fetched once per core) whenever
        # it fits; otherwise stream (blk_k, f_out) blocks like adj.
        sup_resident = 2 * n_pad * f_out * itm <= int(0.25 * vmem_cap)
        acc_into_out = (out_dtype == jnp.float32) or (n_k == 1)
        sup_spec = (pl.BlockSpec((n_pad, f_out), lambda m, kk: (0, 0)) if sup_resident
                    else pl.BlockSpec((blk_k, f_out), lambda m, kk: (kk, 0)))
        scratch_shapes = [] if acc_into_out else [pltpu.VMEM((blk_m, f_out), jnp.float32)]

        h = pl.pallas_call(
            functools.partial(_aggregate_kernel, n_class=n_class,
                              final_layer=final_layer,
                              sup_resident=sup_resident,
                              acc_into_out=acc_into_out),
            out_shape=jax.ShapeDtypeStruct((n_pad, f_out), out_dtype),
            grid=(n_m, n_k),
            in_specs=[pl.BlockSpec((blk_m, blk_k), lambda m, kk: (m, kk)),
                      sup_spec,
                      pl.BlockSpec((1, f_out), lambda m, kk: (0, 0))],
            out_specs=pl.BlockSpec((blk_m, f_out), lambda m, kk: (m, 0)),
            scratch_shapes=scratch_shapes,
            compiler_params=pltpu.CompilerParams(
                dimension_semantics=("parallel", "arbitrary"),
                vmem_limit_bytes=vmem_limit),
        )(adj_pad, support, b)
    return h


def _pad_params(params, mxu_dtype):
    padded = []
    for (w, b) in params:
        f_in, f_out = w.shape
        f_in_p, f_out_p = _round_up(f_in, LANE), _round_up(f_out, LANE)
        w_p = _pad2d(w, f_in_p, f_out_p).astype(mxu_dtype)   # MXU operand dtype
        b_p = _pad2d(b.reshape(1, -1), 1, f_out_p)           # f32, lane-padded
        padded.append((w_p, b_p))
    return padded


@functools.partial(jax.jit, static_argnames=("mxu_dtype", "force_tiled", "blk_m", "blk_k"))
def gcn_forward(x, adj, params, *, mxu_dtype=jnp.bfloat16, force_tiled=False,
                blk_m=512, blk_k=512):
    n, _ = x.shape
    n_class = params[-1][0].shape[1]

    cap = _vmem_capacity_bytes()
    vmem_limit = int(cap * 3 // 4)        # ~96 MiB on v5e/v6e, ~48 MiB on v7x

    params_pad = _pad_params(params, mxu_dtype)
    f_in_pad = params_pad[0][0].shape[0]
    f_max_pad = max([f_in_pad] + [w.shape[1] for (w, _) in params_pad])
    adj_itm = jnp.dtype(mxu_dtype).itemsize

    # Fused-path footprint estimate: adj + x + params + in-kernel activation
    # temporaries (support/agg/h f32 copies), all VMEM-resident.
    n_pad_fused = _round_up(max(n, SUBLANE), SUBLANE)
    fused_bytes = (n_pad_fused * n_pad_fused * adj_itm
                   + n_pad_fused * f_in_pad * adj_itm
                   + sum(w.size * jnp.dtype(w.dtype).itemsize + b.size * 4
                         for (w, b) in params_pad)
                   + 4 * n_pad_fused * f_max_pad * 4)
    use_fused = (not force_tiled) and fused_bytes <= int(0.45 * cap)

    if use_fused:
        n_pad = n_pad_fused
        x_pad = _pad2d(x, n_pad, f_in_pad).astype(mxu_dtype)
        adj_pad = _pad2d(adj, n_pad, n_pad).astype(mxu_dtype)
        out_pad = _gcn_fused(x_pad, adj_pad, params_pad, n_class=n_class,
                             mxu_dtype=mxu_dtype, vmem_limit=vmem_limit)
    else:
        bm = _round_up(max(LANE, min(blk_m, _round_up(n, LANE))), LANE)
        bk = _round_up(max(LANE, min(blk_k, _round_up(n, LANE))), LANE)
        tile_lcm = bm * bk // math.gcd(bm, bk)
        n_pad = _round_up(n, tile_lcm)
        x_pad = _pad2d(x, n_pad, f_in_pad).astype(mxu_dtype)
        adj_pad = _pad2d(adj, n_pad, n_pad).astype(mxu_dtype)
        out_pad = _gcn_tiled(x_pad, adj_pad, params_pad, n_class=n_class,
                             mxu_dtype=mxu_dtype, blk_m=bm, blk_k=bk,
                             vmem_limit=vmem_limit, vmem_cap=cap)
    return out_pad[:n, :n_class]


# ------------------------------ reference / init ------------------------------


def init_gcn_params(key, in_size, hidd_size, n_class):
    """uniform(-stdv, stdv), stdv = 1/sqrt(out_features) — mirrors GraphConvolution.reset_parameters."""
    dims = [in_size] + list(hidd_size) + [n_class]
    params = []
    for f_in, f_out in zip(dims[:-1], dims[1:]):
        key, kw, kb = jax.random.split(key, 3)
        stdv = 1.0 / (f_out ** 0.5)
        w = jax.random.uniform(kw, (f_in, f_out), jnp.float32, -stdv, stdv)
        b = jax.random.uniform(kb, (1, f_out), jnp.float32, -stdv, stdv)
        params.append((w, b))
    return params


def gcn_reference(x, adj, params):
    """Pure-JAX f32 reference of the PyTorch forward (eval mode)."""
    h = jax.nn.relu(x)
    for (w, b) in params:
        support = jnp.dot(h, w, precision=jax.lax.Precision.HIGHEST)
        h = jax.nn.relu(jnp.dot(adj, support, precision=jax.lax.Precision.HIGHEST) + b)
    return jax.nn.log_softmax(h, axis=1)


def _make_graph(key, n):
    k_adj, = jax.random.split(key, 1)
    thresh = 0.7 if n <= 64 else 0.95
    a = (jax.random.uniform(k_adj, (n, n)) > thresh).astype(jnp.float32)
    a = jnp.maximum(a, a.T) + jnp.eye(n, dtype=jnp.float32)
    return a / jnp.sum(a, axis=1, keepdims=True)


# -------------------------------- main ----------------------------------------


if __name__ == "__main__":
    key = jax.random.PRNGKey(0)

    # ---- small config: exercises the fully-fused single-kernel path
    N, IN_SIZE, HIDD_SIZE, N_CLASS = 16, 32, [32, 16], 8
    k_x, k_adj, k_p, key = jax.random.split(key, 4)
    x = jax.random.normal(k_x, (N, IN_SIZE), jnp.float32)
    adj = _make_graph(k_adj, N)
    params = tuple(init_gcn_params(k_p, IN_SIZE, HIDD_SIZE, N_CLASS))

    ref = gcn_reference(x, adj, params)

    out_f32 = gcn_forward(x, adj, params, mxu_dtype=jnp.float32)
    jax.block_until_ready(out_f32)
    assert out_f32.shape == (N, N_CLASS)
    assert jnp.allclose(jnp.sum(jnp.exp(out_f32), axis=1), 1.0, atol=1e-4)
    assert jnp.allclose(out_f32, ref, atol=5e-2), float(jnp.max(jnp.abs(out_f32 - ref)))

    out_bf16 = gcn_forward(x, adj, params)  # default: bf16 MXU operands, f32 accumulate
    jax.block_until_ready(out_bf16)
    assert out_bf16.shape == (N, N_CLASS)
    assert jnp.allclose(jnp.sum(jnp.exp(out_bf16), axis=1), 1.0, atol=1e-4)
    assert jnp.allclose(out_bf16, ref, atol=0.25), float(jnp.max(jnp.abs(out_bf16 - ref)))

    # ---- larger config: exercises the per-layer tiled path
    N2, IN2, HIDD2, C2 = 512, 96, [64, 32], 10
    k_x2, k_adj2, k_p2, key = jax.random.split(key, 4)
    x2 = jax.random.normal(k_x2, (N2, IN2), jnp.float32)
    adj2 = _make_graph(k_adj2, N2)
    params2 = tuple(init_gcn_params(k_p2, IN2, HIDD2, C2))

    ref2 = gcn_reference(x2, adj2, params2)

    # default 512-wide tiles -> single reduction step, support resident, no scratch
    out2 = gcn_forward(x2, adj2, params2, mxu_dtype=jnp.float32, force_tiled=True)
    jax.block_until_ready(out2)
    assert out2.shape == (N2, C2)
    assert jnp.allclose(jnp.sum(jnp.exp(out2), axis=1), 1.0, atol=1e-4)
    assert jnp.allclose(out2, ref2, atol=5e-2), float(jnp.max(jnp.abs(out2 - ref2)))

    # 256-wide tiles -> multi-step reduction: direct accumulation into out_ref (f32)
    out2b = gcn_forward(x2, adj2, params2, mxu_dtype=jnp.float32, force_tiled=True,
                        blk_m=256, blk_k=256)
    jax.block_until_ready(out2b)
    assert jnp.allclose(jnp.sum(jnp.exp(out2b), axis=1), 1.0, atol=1e-4)
    assert jnp.allclose(out2b, ref2, atol=5e-2), float(jnp.max(jnp.abs(out2b - ref2)))

    # bf16 intermediates with multi-step reduction -> f32 scratch accumulator path
    out2_bf16 = gcn_forward(x2, adj2, params2, force_tiled=True, blk_m=256, blk_k=256)
    jax.block_until_ready(out2_bf16)
    assert out2_bf16.shape == (N2, C2)
    assert jnp.allclose(jnp.sum(jnp.exp(out2_bf16), axis=1), 1.0, atol=1e-4)

    print("KERNEL_OK")
</pallas_src>

<mosaic_0001>
module attributes {stable_mosaic.version = 11 : i64} {
  func.func @_gcn_fused_kernel(%arg0: memref<16x128xf32, #tpu.memory_space<vmem>>, %arg1: memref<16x16xf32, #tpu.memory_space<vmem>>, %arg2: memref<128x128xf32, #tpu.memory_space<vmem>>, %arg3: memref<1x128xf32, #tpu.memory_space<vmem>>, %arg4: memref<128x128xf32, #tpu.memory_space<vmem>>, %arg5: memref<1x128xf32, #tpu.memory_space<vmem>>, %arg6: memref<128x128xf32, #tpu.memory_space<vmem>>, %arg7: memref<1x128xf32, #tpu.memory_space<vmem>>, %arg8: memref<16x128xf32, #tpu.memory_space<vmem>>) attributes {dimension_semantics = [], scalar_prefetch = 0 : i64, scratch_operands = 0 : i64, tpu.core_type = #tpu.core_type<tc>} {
    %c0 = arith.constant 0 : index
    %c0_0 = arith.constant 0 : index
    %0 = vector.load %arg1[%c0, %c0_0] : memref<16x16xf32, #tpu.memory_space<vmem>>, vector<16x16xf32>
    %c0_1 = arith.constant 0 : index
    %c0_2 = arith.constant 0 : index
    %1 = vector.load %arg0[%c0_1, %c0_2] : memref<16x128xf32, #tpu.memory_space<vmem>>, vector<16x128xf32>
    %cst = arith.constant 0.000000e+00 : f32
    %2 = vector.broadcast %cst : f32 to vector<16x128xf32>
    %3 = arith.maximumf %1, %2 : vector<16x128xf32>
    %c0_3 = arith.constant 0 : index
    %c0_4 = arith.constant 0 : index
    %4 = vector.load %arg2[%c0_3, %c0_4] : memref<128x128xf32, #tpu.memory_space<vmem>>, vector<128x128xf32>
    %c0_5 = arith.constant 0 : index
    %c0_6 = arith.constant 0 : index
    %5 = vector.load %arg3[%c0_5, %c0_6] : memref<1x128xf32, #tpu.memory_space<vmem>>, vector<1x128xf32>
    %cst_7 = arith.constant dense<0.000000e+00> : vector<16x128xf32>
    %6 = tpu.matmul %3, %4, %cst_7 {dimension_numbers = #tpu.dot_dimension_numbers<[1], [0], [0], [1], [0, 0, 1, 1], [], []>} : vector<16x128xf32>, vector<128x128xf32>, vector<16x128xf32> -> vector<16x128xf32>
    %cst_8 = arith.constant dense<0.000000e+00> : vector<16x128xf32>
    %7 = tpu.matmul %0, %6, %cst_8 {dimension_numbers = #tpu.dot_dimension_numbers<[1], [0], [0], [1], [0, 0, 1, 1], [], []>} : vector<16x16xf32>, vector<16x128xf32>, vector<16x128xf32> -> vector<16x128xf32>
    %8 = vector.broadcast %5 : vector<1x128xf32> to vector<16x128xf32>
    %9 = arith.addf %7, %8 : vector<16x128xf32>
    %cst_9 = arith.constant 0.000000e+00 : f32
    %10 = vector.broadcast %cst_9 : f32 to vector<16x128xf32>
    %11 = arith.maximumf %9, %10 : vector<16x128xf32>
    %c0_10 = arith.constant 0 : index
    %c0_11 = arith.constant 0 : index
    %12 = vector.load %arg4[%c0_10, %c0_11] : memref<128x128xf32, #tpu.memory_space<vmem>>, vector<128x128xf32>
    %c0_12 = arith.constant 0 : index
    %c0_13 = arith.constant 0 : index
    %13 = vector.load %arg5[%c0_12, %c0_13] : memref<1x128xf32, #tpu.memory_space<vmem>>, vector<1x128xf32>
    %cst_14 = arith.constant dense<0.000000e+00> : vector<16x128xf32>
    %14 = tpu.matmul %11, %12, %cst_14 {dimension_numbers = #tpu.dot_dimension_numbers<[1], [0], [0], [1], [0, 0, 1, 1], [], []>} : vector<16x128xf32>, vector<128x128xf32>, vector<16x128xf32> -> vector<16x128xf32>
    %cst_15 = arith.constant dense<0.000000e+00> : vector<16x128xf32>
    %15 = tpu.matmul %0, %14, %cst_15 {dimension_numbers = #tpu.dot_dimension_numbers<[1], [0], [0], [1], [0, 0, 1, 1], [], []>} : vector<16x16xf32>, vector<16x128xf32>, vector<16x128xf32> -> vector<16x128xf32>
    %16 = vector.broadcast %13 : vector<1x128xf32> to vector<16x128xf32>
    %17 = arith.addf %15, %16 : vector<16x128xf32>
    %cst_16 = arith.constant 0.000000e+00 : f32
    %18 = vector.broadcast %cst_16 : f32 to vector<16x128xf32>
    %19 = arith.maximumf %17, %18 : vector<16x128xf32>
    %c0_17 = arith.constant 0 : index
    %c0_18 = arith.constant 0 : index
    %20 = vector.load %arg6[%c0_17, %c0_18] : memref<128x128xf32, #tpu.memory_space<vmem>>, vector<128x128xf32>
    %c0_19 = arith.constant 0 : index
    %c0_20 = arith.constant 0 : index
    %21 = vector.load %arg7[%c0_19, %c0_20] : memref<1x128xf32, #tpu.memory_space<vmem>>, vector<1x128xf32>
    %cst_21 = arith.constant dense<0.000000e+00> : vector<16x128xf32>
    %22 = tpu.matmul %19, %20, %cst_21 {dimension_numbers = #tpu.dot_dimension_numbers<[1], [0], [0], [1], [0, 0, 1, 1], [], []>} : vector<16x128xf32>, vector<128x128xf32>, vector<16x128xf32> -> vector<16x128xf32>
    %cst_22 = arith.constant dense<0.000000e+00> : vector<16x128xf32>
    %23 = tpu.matmul %0, %22, %cst_22 {dimension_numbers = #tpu.dot_dimension_numbers<[1], [0], [0], [1], [0, 0, 1, 1], [], []>} : vector<16x16xf32>, vector<16x128xf32>, vector<16x128xf32> -> vector<16x128xf32>
    %24 = vector.broadcast %21 : vector<1x128xf32> to vector<16x128xf32>
    %25 = arith.addf %23, %24 : vector<16x128xf32>
    %cst_23 = arith.constant 0.000000e+00 : f32
    %26 = vector.broadcast %cst_23 : f32 to vector<16x128xf32>
    %27 = arith.maximumf %25, %26 : vector<16x128xf32>
    %28 = tpu.iota {dimensions = array<i32: 1>} : vector<16x128xi32>
    %c8_i32 = arith.constant 8 : i32
    %29 = vector.broadcast %c8_i32 : i32 to vector<16x128xi32>
    %30 = arith.cmpi slt, %28, %29 : vector<16x128xi32>
    %cst_24 = arith.constant -1.000000e+30 : f32
    %31 = vector.broadcast %cst_24 : f32 to vector<16x128xf32>
    %32 = arith.select %30, %27, %31 : vector<16x128xi1>, vector<16x128xf32>
    %cst_25 = arith.constant dense<0xFF800000> : vector<16xf32>
    %33 = vector.multi_reduction <maximumf>, %32, %cst_25 [1] : vector<16x128xf32> to vector<16xf32>
    %34 = vector.shape_cast %33 : vector<16xf32> to vector<16x1xf32>
    %35 = vector.broadcast %34 : vector<16x1xf32> to vector<16x128xf32>
    %36 = arith.subf %32, %35 : vector<16x128xf32>
    %37 = math.exp %36 : vector<16x128xf32>
    %cst_26 = arith.constant dense<0.000000e+00> : vector<16xf32>
    %38 = vector.multi_reduction <add>, %37, %cst_26 [1] : vector<16x128xf32> to vector<16xf32>
    %39 = vector.shape_cast %38 : vector<16xf32> to vector<16x1xf32>
    %40 = math.log %39 : vector<16x1xf32>
    %41 = vector.broadcast %40 : vector<16x1xf32> to vector<16x128xf32>
    %42 = arith.subf %36, %41 : vector<16x128xf32>
    %cst_27 = arith.constant 0.000000e+00 : f32
    %43 = vector.broadcast %cst_27 : f32 to vector<16x128xf32>
    %44 = arith.select %30, %42, %43 : vector<16x128xi1>, vector<16x128xf32>
    %c0_28 = arith.constant 0 : index
    %c0_29 = arith.constant 0 : index
    %45 = vector.load %arg8[%c0_28, %c0_29] : memref<16x128xf32, #tpu.memory_space<vmem>>, vector<16x128xf32>
    tpu.vector_store %arg8[%c0_28, %c0_29], %44 {strides = array<i32>} : memref<16x128xf32, #tpu.memory_space<vmem>>, vector<16x128xf32>,
    return
  }
}

</mosaic_0001>

<bundles_post_ra>
// kernel: gcn_forward.1
= control target key start
LH: loop header
LB: loop body
LE: loop exit
PB: predicated region body
PF: predicated region fallthrough
CT: control target
= control target key end

     0   :  { %vm78_vm0 = vcmask 130048   ;;  %s532_s2 = inlined_call_operand.vmem [shape: f32[128,128], index: 2, kind: input, shape index: {}]   ;;  %s533_s0 = inlined_call_operand.vmem [shape: f32[16,128], index: 0, kind: input, shape index: {}]   ;;  %s534_s3 = inlined_call_operand.vmem [shape: f32[1,128], index: 3, kind: input, shape index: {}]   ;;  %s535_s4 = inlined_call_operand.vmem [shape: f32[128,128], index: 4, kind: input, shape index: {}]   ;;  %s536_s1 = inlined_call_operand.vmem [shape: f32[16,16], index: 1, kind: input, shape index: {}]   ;;  %s537_s5 = inlined_call_operand.vmem [shape: f32[1,128], index: 5, kind: input, shape index: {}]   ;;  %s538_s6 = inlined_call_operand.vmem [shape: f32[128,128], index: 6, kind: input, shape index: {}]   ;;  %s539_s7 = inlined_call_operand.vmem [shape: f32[1,128], index: 7, kind: input, shape index: {}]   ;;  %s540_s8 = inlined_call_operand.vmem [shape: f32[16,128], index: 8, kind: output, shape index: {}]  }
   0x1   :  { %v50_v0 = vld [vmem:[%s532_s2 + $0x78] sm:$0xff]  ;;  %v49_v1 = vld [vmem:[%s532_s2 + $0x70] sm:$0xff]  ;;  %v48_v2 = vld [vmem:[%s532_s2 + $0x68] sm:$0xff] }
   0x2   :  { %52 = vmatpush.msra.mxu0 %v50_v0  ;;  %v47_v3 = vld [vmem:[%s532_s2 + $0x60] sm:$0xff]  ;;  %v46_v4 = vld [vmem:[%s532_s2 + $0x58] sm:$0xff]  ;;  %v45_v5 = vld [vmem:[%s532_s2 + $0x50] sm:$0xff] }
   0x3   :  { %v44_v6 = vld [vmem:[%s532_s2 + $0x48] sm:$0xff]  ;;  %v43_v7 = vld [vmem:[%s532_s2 + $0x40] sm:$0xff]  ;;  %v42_v8 = vld [vmem:[%s532_s2 + $0x38] sm:$0xff] }
   0x4   :  { %53 = vmatpush.msra.mxu0 %v49_v1  ;;  %v41_v9 = vld [vmem:[%s532_s2 + $0x30] sm:$0xff]  ;;  %v40_v10 = vld [vmem:[%s532_s2 + $0x28] sm:$0xff]  ;;  %v39_v11 = vld [vmem:[%s532_s2 + $0x20] sm:$0xff] }
   0x5   :  { %v38_v12 = vld [vmem:[%s532_s2 + $0x18] sm:$0xff]  ;;  %v37_v13 = vld [vmem:[%s532_s2 + $0x10] sm:$0xff]  ;;  %v31_v14 = vld [vmem:[%s533_s0] sm:$0xff] }
   0x6   :  { %54 = vmatpush.msra.mxu0 %v48_v2  ;;  %v36_v15 = vld [vmem:[%s532_s2 + $0x8] sm:$0xff]  ;;  %v35_v16 = vld [vmem:[%s532_s2] sm:$0xff]  ;;  %v33_v17 = vmax.f32 %v31_v14, 0.0  ;;  %v125_v20 = vld [vmem:[%s535_s4 + $0x78] sm:$0xff] }
   0x7   :  { %v32_v18 = vld [vmem:[%s533_s0 + $0x8] sm:$0xff]  ;;  %v124_v21 = vld [vmem:[%s535_s4 + $0x70] sm:$0xff]  ;;  %127 = vmatpush.msra.mxu2 %v125_v20  ;;  %v122_v23 = vld [vmem:[%s535_s4 + $0x60] sm:$0xff] }
   0x8   :  { %55 = vmatpush.msra.mxu0 %v47_v3  ;;  %v34_v19 = vmax.f32 %v32_v18, 0.0  ;;  %v123_v22 = vld [vmem:[%s535_s4 + $0x68] sm:$0xff]  ;;  %v121_v24 = vld [vmem:[%s535_s4 + $0x58] sm:$0xff]  ;;  %v120_v25 = vld [vmem:[%s535_s4 + $0x50] sm:$0xff] }
   0x9   :  { %128 = vmatpush.msra.mxu2 %v124_v21  ;;  %v119_v26 = vld [vmem:[%s535_s4 + $0x48] sm:$0xff]  ;;  %v118_v28 = vld [vmem:[%s535_s4 + $0x40] sm:$0xff]  ;;  %v117_v29 = vld [vmem:[%s535_s4 + $0x38] sm:$0xff] }
   0xa   :  { %56 = vmatpush.msra.mxu0 %v46_v4  ;;  %v116_v30 = vld [vmem:[%s535_s4 + $0x30] sm:$0xff]  ;;  %v115_v31 = vld [vmem:[%s535_s4 + $0x28] sm:$0xff]  ;;  %v114_v33 = vld [vmem:[%s535_s4 + $0x20] sm:$0xff] }
   0xb   :  { %129 = vmatpush.msra.mxu2 %v123_v22  ;;  %v434_v34 = vld [vmem:[%s536_s1] sm:$0xff]  ;;  %v113_v35 = vld [vmem:[%s535_s4 + $0x18] sm:$0xff]  ;;  %v444_v36 = vld [vmem:[%s536_s1 + $0x8] sm:$0xff] }
   0xc   :  { %57 = vmatpush.msra.mxu0 %v45_v5  ;;  %v112_v37 = vld [vmem:[%s535_s4 + $0x10] sm:$0xff]  ;;  %v111_v38 = vld [vmem:[%s535_s4 + $0x8] sm:$0xff]  ;;  %v110_v39 = vld [vmem:[%s535_s4] sm:$0xff] }
   0xd   :  { %130 = vmatpush.msra.mxu2 %v122_v23  ;;  %v285_v40 = vld [vmem:[%s534_s3] ss:$0 sm:$0xff]  ;;  %v193_v47 = vld [vmem:[%s538_s6 + $0x78] sm:$0xff]  ;;  %v192_v48 = vld [vmem:[%s538_s6 + $0x70] sm:$0xff] }
   0xe   :  { %58 = vmatpush.msra.mxu0 %v44_v6  ;;  %v191_v49 = vld [vmem:[%s538_s6 + $0x68] sm:$0xff]  ;;  %v190_v50 = vld [vmem:[%s538_s6 + $0x60] sm:$0xff]  ;;  %v189_v51 = vld [vmem:[%s538_s6 + $0x58] sm:$0xff] }
   0xf   :  { %131 = vmatpush.msra.mxu2 %v121_v24  ;;  %v188_v52 = vld [vmem:[%s538_s6 + $0x50] sm:$0xff]  ;;  %v187_v53 = vld [vmem:[%s538_s6 + $0x48] sm:$0xff]  ;;  %v186_v55 = vld [vmem:[%s538_s6 + $0x40] sm:$0xff] }
  0x10   :  { %59 = vmatpush.msra.mxu0 %v43_v7  ;;  %v185_v56 = vld [vmem:[%s538_s6 + $0x38] sm:$0xff]  ;;  %v184_v57 = vld [vmem:[%s538_s6 + $0x30] sm:$0xff]  ;;  %v183_v58 = vld [vmem:[%s538_s6 + $0x28] sm:$0xff] }
  0x11   :  { %132 = vmatpush.msra.mxu2 %v120_v25  ;;  %v182_v60 = vld [vmem:[%s538_s6 + $0x20] sm:$0xff]  ;;  %v181_v61 = vld [vmem:[%s538_s6 + $0x18] sm:$0xff]  ;;  %v180_v62 = vld [vmem:[%s538_s6 + $0x10] sm:$0xff] }
  0x12   :  { %60 = vmatpush.msra.mxu0 %v42_v8  ;;  %v179_v63 = vld [vmem:[%s538_s6 + $0x8] sm:$0xff]  ;;  %v178_v0 = vld [vmem:[%s538_s6] sm:$0xff] }
  0x13   :  { %133 = vmatpush.msra.mxu2 %v119_v26  ;;  %v286_v1 = vld [vmem:[%s537_s5] ss:$0 sm:$0xff] }
  0x14   :  { %61 = vmatpush.msra.mxu0 %v41_v9 }
  0x15   :  { %134 = vmatpush.msra.mxu2 %v118_v28 }
  0x16   :  { %62 = vmatpush.msra.mxu0 %v40_v10  ;;  %v246_v10 = vlaneseq }
  0x17   :  { %135 = vmatpush.msra.mxu2 %v117_v29 }
  0x18   :  { %63 = vmatpush.msra.mxu0 %v39_v11  ;;  %v287_v11 = vld [vmem:[%s539_s7] ss:$0 sm:$0xff] }
  0x19   :  { %136 = vmatpush.msra.mxu2 %v116_v30 }
  0x1a   :  { %64 = vmatpush.msra.mxu0 %v38_v12  ;;  %v247_v12 = vand.u32 127, %v246_v10 }
  0x1b   :  { %137 = vmatpush.msra.mxu2 %v115_v31 }
  0x1c   :  { %65 = vmatpush.msra.mxu0 %v37_v13  ;;  %vm248_vm1 = vcmp.lt.s32.totalorder %v247_v12, 8 }
  0x1d   :  { %138 = vmatpush.msra.mxu2 %v114_v33 }
  0x1e   :  { %66 = vmatpush.msra.mxu0 %v36_v15 }
  0x1f   :  { %139 = vmatpush.msra.mxu2 %v113_v35 }
  0x20   :  { %67 = vmatpush.msra.mxu0 %v35_v16 }
  0x21   :  { %68 = vmatmul.f32.vlgmr.msra.gmra.mxu0 %v33_v17  ;;  %140 = vmatpush.msra.mxu2 %v112_v37 }
  0x23   :  { %141 = vmatpush.msra.mxu2 %v111_v38 }
  0x25   :  { %142 = vmatpush.msra.mxu2 %v110_v39 }
  0x29   :  { %71 = vmatmul.f32.gmra.mxu0 %v34_v19 }
  0x9e   :  { %v69_v27 = vpop.f32.mrf.mxu0 }
  0xa6   :  { %v72_v32 = vpop.f32.mrf.mxu0 }
  0xa7   :  { %99 = vmatpush.msra.mxu1 %v72_v32 }
  0xa9   :  { %100 = vmatpush.msra.mxu1 %v69_v27 }
  0xaa   :  { %279 = vmatmul.msk.f32.vlgmr.msra.gmra.mxu1 %vm78_vm0, %v434_v34 }
  0xab   :  { %195 = vmatpush.msrb.mxu1 %v193_v47 }
  0xad   :  { %196 = vmatpush.msrb.mxu1 %v192_v48 }
  0xaf   :  { %197 = vmatpush.msrb.mxu1 %v191_v49 }
  0xb1   :  { %198 = vmatpush.msrb.mxu1 %v190_v50 }
  0xb2   :  { %280 = vmatmul.msk.f32.gmra.mxu1 %vm78_vm0, %v444_v36 }
  0xb3   :  { %199 = vmatpush.msrb.mxu1 %v189_v51 }
  0xb5   :  { %200 = vmatpush.msrb.mxu1 %v188_v52 }
  0xb7   :  { %201 = vmatpush.msrb.mxu1 %v187_v53 }
  0xb9   :  { %202 = vmatpush.msrb.mxu1 %v186_v55 }
  0xbb   :  { %203 = vmatpush.msrb.mxu1 %v185_v56 }
  0xbd   :  { %204 = vmatpush.msrb.mxu1 %v184_v57 }
  0xbf   :  { %205 = vmatpush.msrb.mxu1 %v183_v58 }
  0xc1   :  { %206 = vmatpush.msrb.mxu1 %v182_v60 }
  0xc3   :  { %207 = vmatpush.msrb.mxu1 %v181_v61 }
  0xc5   :  { %208 = vmatpush.msrb.mxu1 %v180_v62 }
  0xc7   :  { %209 = vmatpush.msrb.mxu1 %v179_v63 }
  0xc9   :  { %210 = vmatpush.msrb.mxu1 %v178_v0 }
 0x127   :  { %v102_v41 = vpop.f32.mrf.mxu1 }
 0x128   :  { %v103_v42 = vadd.f32 %v285_v40, %v102_v41 }
 0x12a   :  { %v108_v43 = vmax.f32 %v103_v42, 0.0 }
 0x12c   :  { %143 = vmatmul.f32.vlgmr.msra.gmra.mxu2 %v108_v43 }
 0x12f   :  { %v105_v44 = vpop.f32.mrf.mxu1 }
 0x130   :  { %v106_v45 = vadd.f32 %v285_v40, %v105_v44 }
 0x132   :  { %v109_v46 = vmax.f32 %v106_v45, 0.0 }
 0x134   :  { %146 = vmatmul.f32.gmra.mxu2 %v109_v46 }
 0x1af   :  { %v144_v54 = vpop.f32.mrf.mxu2 }
 0x1b7   :  { %v147_v59 = vpop.f32.mrf.mxu2 }
 0x1b8   :  { %167 = vmatpush.msra.mxu3 %v147_v59 }
 0x1ba   :  { %168 = vmatpush.msra.mxu3 %v144_v54 }
 0x1bb   :  { %281 = vmatmul.msk.f32.vlgmr.msra.gmra.mxu3 %vm78_vm0, %v434_v34 }
 0x1c3   :  { %282 = vmatmul.msk.f32.gmra.mxu3 %vm78_vm0, %v444_v36 }
 0x23e   :  { %v170_v2 = vpop.f32.mrf.mxu3 }
 0x23f   :  { %v171_v3 = vadd.f32 %v286_v1, %v170_v2 }
 0x241   :  { %v176_v4 = vmax.f32 %v171_v3, 0.0 }
 0x243   :  { %211 = vmatmul.f32.vlgmr.msrb.gmra.mxu1 %v176_v4 }
 0x246   :  { %v173_v5 = vpop.f32.mrf.mxu3 }
 0x247   :  { %v174_v6 = vadd.f32 %v286_v1, %v173_v5 }
 0x249   :  { %v177_v7 = vmax.f32 %v174_v6, 0.0 }
 0x24b   :  { %214 = vmatmul.f32.gmra.mxu1 %v177_v7 }
 0x2c0   :  { %v212_v8 = vpop.f32.mrf.mxu1 }
 0x2c8   :  { %v215_v9 = vpop.f32.mrf.mxu1 }
 0x2c9   :  { %235 = vmatpush.msrb.mxu3 %v215_v9 }
 0x2cb   :  { %236 = vmatpush.msrb.mxu3 %v212_v8 }
 0x2cc   :  { %283 = vmatmul.msk.f32.vlgmr.msrb.gmra.mxu3 %vm78_vm0, %v434_v34 }
 0x2d4   :  { %284 = vmatmul.msk.f32.gmra.mxu3 %vm78_vm0, %v444_v36 }
 0x34f   :  { %v238_v13 = vpop.f32.mrf.mxu3 }
 0x350   :  { %v239_v14 = vadd.f32 %v287_v11, %v238_v13 }
 0x352   :  { %v244_v15 = vmax.f32 %v239_v14, 0.0 }
 0x354   :  { %v249_v16 = vsel %vm248_vm1, %v244_v15, -1e+30 }
 0x355   :  { %251 = vmax.xlane.f32.xlu0 %v249_v16 }
 0x357   :  { %v241_v17 = vpop.f32.mrf.mxu3 }
 0x358   :  { %v242_v18 = vadd.f32 %v287_v11, %v241_v17 }
 0x35a   :  { %v245_v19 = vmax.f32 %v242_v18, 0.0 }
 0x35c   :  { %v250_v20 = vsel %vm248_vm1, %v245_v19, -1e+30 }
 0x35d   :  { %253 = vmax.xlane.f32.xlu0 %v250_v20 }
 0x3c8   :  { %v252_v21 = vpop.xlane.xlu0 %251 }
 0x3c9   :  { %v255_v22 = vsub.f32 %v249_v16, %v252_v21 }
 0x3cb   :  { %v257_v23 = vmul.f32 1.442695, %v255_v22 }
 0x3cd   :  { %288 = vpow2.f32 %v257_v23 }
 0x3d0   :  { %v254_v24 = vpop.xlane.xlu0 %253 }
 0x3d1   :  { %v256_v25 = vsub.f32 %v250_v20, %v254_v24 }
 0x3d3   :  { %v289_v26 = vpop.eup %288  ;;  %v259_v27 = vmul.f32 1.442695, %v256_v25 }
 0x3d4   :  { %261 = vadd.xlane.f32.xlu1 %v289_v26 }
 0x3d5   :  { %290 = vpow2.f32 %v259_v27 }
 0x3db   :  { %v291_v28 = vpop.eup %290 }
 0x3dc   :  { %263 = vadd.xlane.f32.xlu1 %v291_v28 }
 0x447   :  { %v262_v29 = vpop.xlane.xlu1 %261 }
 0x448   :  { %292 = vlog2.f32 %v262_v29 }
 0x44e   :  { %v293_v30 = vpop.eup %292 }
 0x44f   :  { %v266_v31 = vmul.f32 0.6931472, %v293_v30  ;;  %v264_v32 = vpop.xlane.xlu1 %263 }
 0x450   :  { %294 = vlog2.f32 %v264_v32 }
 0x451   :  { %v269_v33 = vsub.f32 %v255_v22, %v266_v31 }
 0x453   :  { %v271_v34 = vsel %vm248_vm1, %v269_v33, 0.0 }
 0x454   :  { %273 = vst [vmem:[%s540_s8] sm:$0xff] %v271_v34 }
 0x456   :  { %v295_v35 = vpop.eup %294 }
 0x457   :  { %v268_v36 = vmul.f32 0.6931472, %v295_v35 }
 0x459   :  { %v270_v37 = vsub.f32 %v256_v25, %v268_v36 }
 0x45b   :  { %v272_v38 = vsel %vm248_vm1, %v270_v37, 0.0 }
 0x45c   :  { %274 = vst [vmem:[%s540_s8 + $0x8] sm:$0xff] %v272_v38 }

</bundles_post_ra>
